<compile_context>
chip_gen: v5e
topology: v5e:2x2
jax: 0.10.0
libtpu: 0.0.40
codegen_flags: <defaults>
</compile_context>

<pallas_src>
import math

import jax
import jax.numpy as jnp
from jax.experimental import pallas as pl
from jax.experimental.pallas import tpu as pltpu


FEAT_DIM = 512
HIDDEN_DIM = 128
LANE = 128
MAX_ROW_TILE = 256                     # rows (= batch*channels) per image block
TARGET_BLOCK_BYTES = 4 * 1024 * 1024   # ~4 MiB of image bytes per input per grid step


def _round_up(x, m):
    return (x + m - 1) // m * m


def fusion_net_forward(lcc, lmlo, params, aggregation="avg"):
    """Mirrors FusionNet.forward; returns (None, softmax_probs)."""
    assert aggregation in ("avg", "cat")
    assert lcc.shape == lmlo.shape and lcc.dtype == lmlo.dtype
    B, C, H, W = lcc.shape
    HW = H * W
    R = B * C
    itemsize = jnp.dtype(lcc.dtype).itemsize

    # ---- row tiling: rows are flattened (batch, channel) pairs --------------
    if R <= MAX_ROW_TILE:
        row_tile, n_row_tiles, b_tile = R, 1, B
    else:
        base = math.lcm(8, C)          # whole batch elements per tile, 8-sublane aligned
        row_tile = base * max(1, MAX_ROW_TILE // base)
        n_row_tiles = pl.cdiv(R, row_tile)
        b_tile = row_tile // C
    # TODO(synk): with a single row tile (small batch), only one TensorCore is
    # used on multi-core parts (v7x); splitting the spatial reduction across
    # cores would need a partial-sum combine pass.

    # ---- spatial tiling: big, lane-aligned tiles (~TARGET_BLOCK_BYTES each) --
    target_lanes = max(LANE, (TARGET_BLOCK_BYTES // (row_tile * itemsize)) // LANE * LANE)
    hw_tile = min(_round_up(HW, LANE), target_lanes)
    n_s = pl.cdiv(HW, hw_tile)
    has_tail = (HW % hw_tile) != 0
    tail_valid = HW - (n_s - 1) * hw_tile      # static lanes valid in the last block

    acc_w = 512
    while hw_tile % acc_w:
        acc_w //= 2                    # hw_tile is a multiple of 128, so acc_w >= 128

    # ---- flat image views: free reshape, no pad/astype HBM passes -----------
    lcc2 = lcc.reshape(R, HW)
    mlo2 = lmlo.reshape(R, HW)

    # ---- tiny parameters prepared once on the wrapper side ------------------
    inv_hw = 1.0 / float(HW)
    wbb = params["wbb"].astype(jnp.float32) * inv_hw          # GAP divisor folded in
    wbbx = jnp.tile(wbb, (b_tile, 1))                          # [row_tile, 512], row r -> channel r % C
    bbb = params["bbb"].astype(jnp.float32)                    # [1, 512]
    sel = (jnp.arange(row_tile)[None, :] // C
           == jnp.arange(b_tile)[:, None]).astype(jnp.float32)  # [b_tile, row_tile] 0/1

    if aggregation == "avg":
        # ((f_lcc + f_mlo)/2) @ W == f_lcc @ (W/2) + f_mlo @ (W/2)
        w_half = 0.5 * params["fc_avg_w"]
        w1 = jnp.concatenate([w_half, w_half], axis=0)
        b1 = params["fc_avg_b"]
    else:
        w1 = params["fc_cat_w"]
        b1 = params["fc_cat_b"]
    w1 = w1.astype(jnp.float32)                                # [1024, 128]
    b1 = b1.astype(jnp.float32)                                # [1, 128]

    w2 = params["fc_w"].astype(jnp.float32)
    b2 = params["fc_b"].astype(jnp.float32)
    num_classes = w2.shape[1]
    nc_pad = _round_up(num_classes, LANE)
    # Lane-dense logits: zero-pad the weight columns; padded biases = -1e30
    # (safe finite sentinel: the logits path stays f32) so padded classes
    # vanish under softmax.
    w2 = jnp.pad(w2, ((0, 0), (0, nc_pad - num_classes)))
    b2 = jnp.pad(b2, ((0, 0), (0, nc_pad - num_classes)), constant_values=-1e30)

    # ------------------------------ kernel -----------------------------------
    def kernel(lcc_ref, mlo_ref, wbbx_ref, bbb_ref, sel_ref,
               w1_ref, b1_ref, w2_ref, b2_ref,
               out_ref, acc_lcc_ref, acc_mlo_ref):
        s = pl.program_id(1)

        @pl.when(s == 0)
        def _init():
            acc_lcc_ref[...] = jnp.zeros_like(acc_lcc_ref)
            acc_mlo_ref[...] = jnp.zeros_like(acc_mlo_ref)

        def accumulate(x_ref, acc_ref_, valid):
            # Sum the first `valid` lanes (static) of the (rows, hw_tile) block
            # into the (rows, acc_w) accumulator.  Pure VPU adds with two
            # interleaved carries (short dependency chain); no cross-lane
            # reduce here.
            rows = acc_ref_.shape[0]
            nfull = valid // acc_w
            rem = valid - nfull * acc_w
            c0 = jnp.zeros((rows, acc_w), jnp.float32)
            c1 = jnp.zeros((rows, acc_w), jnp.float32)
            for g in range(nfull):
                v = x_ref[:, g * acc_w:(g + 1) * acc_w].astype(jnp.float32)
                if g % 2 == 0:
                    c0 = c0 + v
                else:
                    c1 = c1 + v
            if rem > 0:
                start = nfull * acc_w
                v = x_ref[:, start:start + acc_w].astype(jnp.float32)
                lane = jax.lax.broadcasted_iota(jnp.int32, (rows, acc_w), 1)
                c1 = c1 + jnp.where(lane < rem, v, 0.0)
            acc_ref_[...] = acc_ref_[...] + c0 + c1

        if not has_tail:
            accumulate(lcc_ref, acc_lcc_ref, hw_tile)
            accumulate(mlo_ref, acc_mlo_ref, hw_tile)
        elif n_s == 1:
            accumulate(lcc_ref, acc_lcc_ref, tail_valid)
            accumulate(mlo_ref, acc_mlo_ref, tail_valid)
        else:
            @pl.when(s < n_s - 1)
            def _full():
                accumulate(lcc_ref, acc_lcc_ref, hw_tile)
                accumulate(mlo_ref, acc_mlo_ref, hw_tile)

            @pl.when(s == n_s - 1)
            def _tail():
                accumulate(lcc_ref, acc_lcc_ref, tail_valid)
                accumulate(mlo_ref, acc_mlo_ref, tail_valid)

        # ---- head: only on the last spatial step ----------------------------
        @pl.when(s == n_s - 1)
        def _head():
            def view_features(acc_ref_):
                # One cross-lane collapse per row tile, then regroup the
                # (b_tile*C) row sums into per-batch GAP features with a
                # constant selection matmul (wbbx already carries 1/HW and is
                # row-replicated over batch): no in-kernel reshapes.
                rowsum = jnp.sum(acc_ref_[...], axis=-1, keepdims=True)   # [rows, 1]
                t = rowsum * wbbx_ref[...]                                 # [rows, 512]
                f = jnp.dot(sel_ref[...], t,
                            preferred_element_type=jnp.float32) + bbb_ref[...]
                return jnp.maximum(f, 0.0)                                 # [b_tile, 512]

            f_lcc = view_features(acc_lcc_ref)
            f_mlo = view_features(acc_mlo_ref)

            # Aggregation + fc_{avg,cat} as a split matmul against the stacked
            # [1024, 128] weight (avg path: both halves are 0.5 * fc_avg_w).
            h = (jnp.dot(f_lcc, w1_ref[0:FEAT_DIM, :],
                         preferred_element_type=jnp.float32)
                 + jnp.dot(f_mlo, w1_ref[FEAT_DIM:2 * FEAT_DIM, :],
                           preferred_element_type=jnp.float32)
                 + b1_ref[...])                                # [b_tile, 128]
            h = jnp.maximum(h, 0.0)                            # ReLU
            # nn.Dropout(p) is identity at inference time.
            # TODO(synk): training-mode dropout (pltpu.prng_*) not implemented.

            logits = jnp.dot(h, w2_ref[...],
                             preferred_element_type=jnp.float32) + b2_ref[...]
            logits = logits - jnp.max(logits, axis=1, keepdims=True)
            e = jnp.exp(logits)
            out_ref[...] = e / jnp.sum(e, axis=1, keepdims=True)   # exact normalization

    # ------------------------------ specs / call ------------------------------
    grid = (n_row_tiles, n_s)

    img_spec = pl.BlockSpec((row_tile, hw_tile), lambda i, s: (i, s))

    def full_spec(arr):
        nd = arr.ndim
        return pl.BlockSpec(arr.shape, lambda i, s, _nd=nd: (0,) * _nd)

    out_rows = n_row_tiles * b_tile

    flops = int(2 * 2 * R * HW
                + 2 * (2 * B * row_tile * FEAT_DIM
                       + 2 * B * FEAT_DIM * HIDDEN_DIM
                       + B * HIDDEN_DIM * nc_pad))
    bytes_accessed = int(2 * R * HW * itemsize
                         + (wbbx.size + sel.size + w1.size + w2.size) * 4
                         + out_rows * nc_pad * 4)
    cost = pl.CostEstimate(flops=flops, transcendentals=int(B * nc_pad),
                           bytes_accessed=bytes_accessed)

    img_block_bytes = row_tile * hw_tile * itemsize
    const_bytes = (wbbx.size + bbb.size + sel.size + w1.size + b1.size
                   + w2.size + b2.size) * 4
    need = (2 * 2 * img_block_bytes                  # two streamed inputs, double-buffered
            + 2 * (const_bytes + b_tile * nc_pad * 4)
            + 2 * row_tile * acc_w * 4)
    vmem_limit = int(min(96 * 2 ** 20, max(32 * 2 ** 20, need + (8 << 20))))

    probs_padded = pl.pallas_call(
        kernel,
        out_shape=jax.ShapeDtypeStruct((out_rows, nc_pad), jnp.float32),
        grid=grid,
        in_specs=[img_spec, img_spec,
                  full_spec(wbbx), full_spec(bbb), full_spec(sel),
                  full_spec(w1), full_spec(b1), full_spec(w2), full_spec(b2)],
        out_specs=pl.BlockSpec((b_tile, nc_pad), lambda i, s: (i, 0)),
        scratch_shapes=[pltpu.VMEM((row_tile, acc_w), jnp.float32),
                        pltpu.VMEM((row_tile, acc_w), jnp.float32)],
        compiler_params=pltpu.CompilerParams(
            dimension_semantics=("parallel", "arbitrary"),
            vmem_limit_bytes=vmem_limit),
        cost_estimate=cost,
    )(lcc2, mlo2, wbbx, bbb, sel, w1, b1, w2, b2)

    return None, probs_padded[:B, :num_classes]


def init_params(key, in_channels, num_classes=3):
    """Deterministic synthetic parameters (PyTorch nn.Linear-style uniform init)."""
    ks = jax.random.split(key, 10)

    def linear(kw, kb, fan_in, fan_out):
        bound = 1.0 / (fan_in ** 0.5)
        w = jax.random.uniform(kw, (fan_in, fan_out), jnp.float32, -bound, bound)
        b = jax.random.uniform(kb, (1, fan_out), jnp.float32, -bound, bound)
        return w, b

    wbb, bbb = linear(ks[0], ks[1], in_channels, FEAT_DIM)               # backbone stub
    fc_avg_w, fc_avg_b = linear(ks[2], ks[3], FEAT_DIM, HIDDEN_DIM)      # fc_avg 512->128
    fc_cat_w, fc_cat_b = linear(ks[4], ks[5], 2 * FEAT_DIM, HIDDEN_DIM)  # fc_cat 1024->128
    fc_w, fc_b = linear(ks[6], ks[7], HIDDEN_DIM, num_classes)           # fc 128->3

    return dict(wbb=wbb, bbb=bbb,
                fc_avg_w=fc_avg_w, fc_avg_b=fc_avg_b,
                fc_cat_w=fc_cat_w, fc_cat_b=fc_cat_b,
                fc_w=fc_w, fc_b=fc_b)


def _reference_forward(lcc, lmlo, params, aggregation):
    """Pure-JAX f32 reference matching the module semantics."""
    B, C, H, W = lcc.shape

    def backbone(x):
        gap = jnp.mean(x.reshape(B, C, H * W), axis=-1)
        return jnp.maximum(gap @ params["wbb"] + params["bbb"], 0.0)

    f_lcc = backbone(lcc)
    f_mlo = backbone(lmlo)
    if aggregation == "avg":
        h = ((f_lcc + f_mlo) * 0.5) @ params["fc_avg_w"] + params["fc_avg_b"]
    else:
        h = (jnp.concatenate([f_lcc, f_mlo], axis=1) @ params["fc_cat_w"]
             + params["fc_cat_b"])
    h = jnp.maximum(h, 0.0)
    logits = h @ params["fc_w"] + params["fc_b"]
    return jax.nn.softmax(logits, axis=1)


if __name__ == "__main__":
    key = jax.random.PRNGKey(0)
    k_lcc, k_mlo, k_p = jax.random.split(key, 3)

    B, C, H, W = 2, 4, 16, 16
    lcc = jax.random.normal(k_lcc, (B, C, H, W), jnp.float32)
    lmlo = jax.random.normal(k_mlo, (B, C, H, W), jnp.float32)
    params = init_params(k_p, C, num_classes=3)

    _, probs_avg = fusion_net_forward(lcc, lmlo, params, aggregation="avg")
    _, probs_cat = fusion_net_forward(lcc, lmlo, params, aggregation="cat")
    jax.block_until_ready((probs_avg, probs_cat))

    # sanity: shapes, rows sum to ~1 (exact normalization, f32 throughout)
    assert probs_avg.shape == (B, 3) and probs_cat.shape == (B, 3)
    assert jnp.allclose(jnp.sum(probs_avg, axis=1), 1.0, atol=1e-5)
    assert jnp.allclose(jnp.sum(probs_cat, axis=1), 1.0, atol=1e-5)

    # correctness vs pure-JAX f32 reference
    ref_avg = _reference_forward(lcc, lmlo, params, "avg")
    ref_cat = _reference_forward(lcc, lmlo, params, "cat")
    assert jnp.allclose(probs_avg, ref_avg, atol=1e-4)
    assert jnp.allclose(probs_cat, ref_cat, atol=1e-4)

    print("KERNEL_OK")
</pallas_src>

<mosaic_0001>
module attributes {stable_mosaic.version = 11 : i64} {
  func.func @kernel(%arg0: i32, %arg1: i32, %arg2: memref<8x256xf32, #tpu.memory_space<vmem>>, %arg3: memref<8x256xf32, #tpu.memory_space<vmem>>, %arg4: memref<8x512xf32, #tpu.memory_space<vmem>>, %arg5: memref<1x512xf32, #tpu.memory_space<vmem>>, %arg6: memref<2x8xf32, #tpu.memory_space<vmem>>, %arg7: memref<1024x128xf32, #tpu.memory_space<vmem>>, %arg8: memref<1x128xf32, #tpu.memory_space<vmem>>, %arg9: memref<128x128xf32, #tpu.memory_space<vmem>>, %arg10: memref<1x128xf32, #tpu.memory_space<vmem>>, %arg11: memref<2x128xf32, #tpu.memory_space<vmem>>, %arg12: memref<8x256xf32, #tpu.memory_space<vmem>>, %arg13: memref<8x256xf32, #tpu.memory_space<vmem>>) attributes {dimension_semantics = [#tpu.dimension_semantics<parallel>, #tpu.dimension_semantics<arbitrary>], iteration_bounds = array<i64: 1, 1>, scalar_prefetch = 0 : i64, scratch_operands = 2 : i64, tpu.core_type = #tpu.core_type<tc>, window_params = [{transform_indices = @transform_0, window_bounds = array<i64: 8, 256>}, {transform_indices = @transform_1, window_bounds = array<i64: 8, 256>}, {pipeline_mode = #tpu.pipeline_mode<synchronous>, transform_indices = @transform_2, window_bounds = array<i64: 8, 512>}, {pipeline_mode = #tpu.pipeline_mode<synchronous>, transform_indices = @transform_3, window_bounds = array<i64: 1, 512>}, {pipeline_mode = #tpu.pipeline_mode<synchronous>, transform_indices = @transform_4, window_bounds = array<i64: 2, 8>}, {pipeline_mode = #tpu.pipeline_mode<synchronous>, transform_indices = @transform_5, window_bounds = array<i64: 1024, 128>}, {pipeline_mode = #tpu.pipeline_mode<synchronous>, transform_indices = @transform_6, window_bounds = array<i64: 1, 128>}, {pipeline_mode = #tpu.pipeline_mode<synchronous>, transform_indices = @transform_7, window_bounds = array<i64: 128, 128>}, {pipeline_mode = #tpu.pipeline_mode<synchronous>, transform_indices = @transform_8, window_bounds = array<i64: 1, 128>}, {transform_indices = @transform_9, window_bounds = array<i64: 2, 128>}]} {
    %c0_i32 = arith.constant 0 : i32
    %0 = arith.cmpi eq, %arg1, %c0_i32 : i32
    %1 = arith.extui %0 : i1 to i32
    %c0_i32_0 = arith.constant 0 : i32
    %2 = arith.cmpi ne, %1, %c0_i32_0 : i32
    scf.if %2 {
      %cst_17 = arith.constant 0.000000e+00 : f32
      %22 = vector.broadcast %cst_17 : f32 to vector<8x256xf32>
      %c0_18 = arith.constant 0 : index
      %c0_19 = arith.constant 0 : index
      %23 = vector.load %arg12[%c0_18, %c0_19] : memref<8x256xf32, #tpu.memory_space<vmem>>, vector<8x256xf32>
      tpu.vector_store %arg12[%c0_18, %c0_19], %22 {strides = array<i32>} : memref<8x256xf32, #tpu.memory_space<vmem>>, vector<8x256xf32>,
      %cst_20 = arith.constant 0.000000e+00 : f32
      %24 = vector.broadcast %cst_20 : f32 to vector<8x256xf32>
      %c0_21 = arith.constant 0 : index
      %c0_22 = arith.constant 0 : index
      %25 = vector.load %arg13[%c0_21, %c0_22] : memref<8x256xf32, #tpu.memory_space<vmem>>, vector<8x256xf32>
      tpu.vector_store %arg13[%c0_21, %c0_22], %24 {strides = array<i32>} : memref<8x256xf32, #tpu.memory_space<vmem>>, vector<8x256xf32>,
    } else {
    }
    %cst = arith.constant 0.000000e+00 : f32
    %3 = vector.broadcast %cst : f32 to vector<8x256xf32>
    %cst_1 = arith.constant 0.000000e+00 : f32
    %4 = vector.broadcast %cst_1 : f32 to vector<8x256xf32>
    %c0 = arith.constant 0 : index
    %c0_2 = arith.constant 0 : index
    %5 = vector.load %arg2[%c0, %c0_2] : memref<8x256xf32, #tpu.memory_space<vmem>>, vector<8x256xf32>
    %6 = arith.addf %3, %5 : vector<8x256xf32>
    %c0_3 = arith.constant 0 : index
    %c0_4 = arith.constant 0 : index
    %7 = vector.load %arg12[%c0_3, %c0_4] : memref<8x256xf32, #tpu.memory_space<vmem>>, vector<8x256xf32>
    %8 = arith.addf %7, %6 : vector<8x256xf32>
    %9 = arith.addf %8, %4 : vector<8x256xf32>
    %c0_5 = arith.constant 0 : index
    %c0_6 = arith.constant 0 : index
    %10 = vector.load %arg12[%c0_5, %c0_6] : memref<8x256xf32, #tpu.memory_space<vmem>>, vector<8x256xf32>
    tpu.vector_store %arg12[%c0_5, %c0_6], %9 {strides = array<i32>} : memref<8x256xf32, #tpu.memory_space<vmem>>, vector<8x256xf32>,
    %cst_7 = arith.constant 0.000000e+00 : f32
    %11 = vector.broadcast %cst_7 : f32 to vector<8x256xf32>
    %cst_8 = arith.constant 0.000000e+00 : f32
    %12 = vector.broadcast %cst_8 : f32 to vector<8x256xf32>
    %c0_9 = arith.constant 0 : index
    %c0_10 = arith.constant 0 : index
    %13 = vector.load %arg3[%c0_9, %c0_10] : memref<8x256xf32, #tpu.memory_space<vmem>>, vector<8x256xf32>
    %14 = arith.addf %11, %13 : vector<8x256xf32>
    %c0_11 = arith.constant 0 : index
    %c0_12 = arith.constant 0 : index
    %15 = vector.load %arg13[%c0_11, %c0_12] : memref<8x256xf32, #tpu.memory_space<vmem>>, vector<8x256xf32>
    %16 = arith.addf %15, %14 : vector<8x256xf32>
    %17 = arith.addf %16, %12 : vector<8x256xf32>
    %c0_13 = arith.constant 0 : index
    %c0_14 = arith.constant 0 : index
    %18 = vector.load %arg13[%c0_13, %c0_14] : memref<8x256xf32, #tpu.memory_space<vmem>>, vector<8x256xf32>
    tpu.vector_store %arg13[%c0_13, %c0_14], %17 {strides = array<i32>} : memref<8x256xf32, #tpu.memory_space<vmem>>, vector<8x256xf32>,
    %c0_i32_15 = arith.constant 0 : i32
    %19 = arith.cmpi eq, %arg1, %c0_i32_15 : i32
    %20 = arith.extui %19 : i1 to i32
    %c0_i32_16 = arith.constant 0 : i32
    %21 = arith.cmpi ne, %20, %c0_i32_16 : i32
    scf.if %21 {
      %c0_17 = arith.constant 0 : index
      %c0_18 = arith.constant 0 : index
      %22 = vector.load %arg12[%c0_17, %c0_18] : memref<8x256xf32, #tpu.memory_space<vmem>>, vector<8x256xf32>
      %cst_19 = arith.constant dense<0.000000e+00> : vector<8xf32>
      %23 = vector.multi_reduction <add>, %22, %cst_19 [1] : vector<8x256xf32> to vector<8xf32>
      %24 = vector.shape_cast %23 : vector<8xf32> to vector<8x1xf32>
      %c0_20 = arith.constant 0 : index
      %c0_21 = arith.constant 0 : index
      %25 = vector.load %arg4[%c0_20, %c0_21] : memref<8x512xf32, #tpu.memory_space<vmem>>, vector<8x512xf32>
      %26 = vector.broadcast %24 : vector<8x1xf32> to vector<8x512xf32>
      %27 = arith.mulf %26, %25 : vector<8x512xf32>
      %c0_22 = arith.constant 0 : index
      %c0_23 = arith.constant 0 : index
      %28 = vector.load %arg6[%c0_22, %c0_23] : memref<2x8xf32, #tpu.memory_space<vmem>>, vector<2x8xf32>
      %cst_24 = arith.constant dense<0.000000e+00> : vector<2x512xf32>
      %29 = tpu.matmul %28, %27, %cst_24 {dimension_numbers = #tpu.dot_dimension_numbers<[1], [0], [0], [1], [0, 0, 1, 1], [], []>} : vector<2x8xf32>, vector<8x512xf32>, vector<2x512xf32> -> vector<2x512xf32>
      %c0_25 = arith.constant 0 : index
      %c0_26 = arith.constant 0 : index
      %30 = vector.load %arg5[%c0_25, %c0_26] : memref<1x512xf32, #tpu.memory_space<vmem>>, vector<1x512xf32>
      %31 = vector.broadcast %30 : vector<1x512xf32> to vector<2x512xf32>
      %32 = arith.addf %29, %31 : vector<2x512xf32>
      %cst_27 = arith.constant 0.000000e+00 : f32
      %33 = vector.broadcast %cst_27 : f32 to vector<2x512xf32>
      %34 = arith.maximumf %32, %33 : vector<2x512xf32>
      %c0_28 = arith.constant 0 : index
      %c0_29 = arith.constant 0 : index
      %35 = vector.load %arg13[%c0_28, %c0_29] : memref<8x256xf32, #tpu.memory_space<vmem>>, vector<8x256xf32>
      %cst_30 = arith.constant dense<0.000000e+00> : vector<8xf32>
      %36 = vector.multi_reduction <add>, %35, %cst_30 [1] : vector<8x256xf32> to vector<8xf32>
      %37 = vector.shape_cast %36 : vector<8xf32> to vector<8x1xf32>
      %c0_31 = arith.constant 0 : index
      %c0_32 = arith.constant 0 : index
      %38 = vector.load %arg4[%c0_31, %c0_32] : memref<8x512xf32, #tpu.memory_space<vmem>>, vector<8x512xf32>
      %39 = vector.broadcast %37 : vector<8x1xf32> to vector<8x512xf32>
      %40 = arith.mulf %39, %38 : vector<8x512xf32>
      %c0_33 = arith.constant 0 : index
      %c0_34 = arith.constant 0 : index
      %41 = vector.load %arg6[%c0_33, %c0_34] : memref<2x8xf32, #tpu.memory_space<vmem>>, vector<2x8xf32>
      %cst_35 = arith.constant dense<0.000000e+00> : vector<2x512xf32>
      %42 = tpu.matmul %41, %40, %cst_35 {dimension_numbers = #tpu.dot_dimension_numbers<[1], [0], [0], [1], [0, 0, 1, 1], [], []>} : vector<2x8xf32>, vector<8x512xf32>, vector<2x512xf32> -> vector<2x512xf32>
      %c0_36 = arith.constant 0 : index
      %c0_37 = arith.constant 0 : index
      %43 = vector.load %arg5[%c0_36, %c0_37] : memref<1x512xf32, #tpu.memory_space<vmem>>, vector<1x512xf32>
      %44 = vector.broadcast %43 : vector<1x512xf32> to vector<2x512xf32>
      %45 = arith.addf %42, %44 : vector<2x512xf32>
      %cst_38 = arith.constant 0.000000e+00 : f32
      %46 = vector.broadcast %cst_38 : f32 to vector<2x512xf32>
      %47 = arith.maximumf %45, %46 : vector<2x512xf32>
      %c0_39 = arith.constant 0 : index
      %c0_40 = arith.constant 0 : index
      %48 = vector.load %arg7[%c0_39, %c0_40] : memref<1024x128xf32, #tpu.memory_space<vmem>>, vector<512x128xf32>
      %cst_41 = arith.constant dense<0.000000e+00> : vector<2x128xf32>
      %49 = tpu.matmul %34, %48, %cst_41 {dimension_numbers = #tpu.dot_dimension_numbers<[1], [0], [0], [1], [0, 0, 1, 1], [], []>} : vector<2x512xf32>, vector<512x128xf32>, vector<2x128xf32> -> vector<2x128xf32>
      %c512 = arith.constant 512 : index
      %c0_42 = arith.constant 0 : index
      %50 = vector.load %arg7[%c512, %c0_42] : memref<1024x128xf32, #tpu.memory_space<vmem>>, vector<512x128xf32>
      %cst_43 = arith.constant dense<0.000000e+00> : vector<2x128xf32>
      %51 = tpu.matmul %47, %50, %cst_43 {dimension_numbers = #tpu.dot_dimension_numbers<[1], [0], [0], [1], [0, 0, 1, 1], [], []>} : vector<2x512xf32>, vector<512x128xf32>, vector<2x128xf32> -> vector<2x128xf32>
      %52 = arith.addf %49, %51 : vector<2x128xf32>
      %c0_44 = arith.constant 0 : index
      %c0_45 = arith.constant 0 : index
      %53 = vector.load %arg8[%c0_44, %c0_45] : memref<1x128xf32, #tpu.memory_space<vmem>>, vector<1x128xf32>
      %54 = vector.broadcast %53 : vector<1x128xf32> to vector<2x128xf32>
      %55 = arith.addf %52, %54 : vector<2x128xf32>
      %cst_46 = arith.constant 0.000000e+00 : f32
      %56 = vector.broadcast %cst_46 : f32 to vector<2x128xf32>
      %57 = arith.maximumf %55, %56 : vector<2x128xf32>
      %c0_47 = arith.constant 0 : index
      %c0_48 = arith.constant 0 : index
      %58 = vector.load %arg9[%c0_47, %c0_48] : memref<128x128xf32, #tpu.memory_space<vmem>>, vector<128x128xf32>
      %cst_49 = arith.constant dense<0.000000e+00> : vector<2x128xf32>
      %59 = tpu.matmul %57, %58, %cst_49 {dimension_numbers = #tpu.dot_dimension_numbers<[1], [0], [0], [1], [0, 0, 1, 1], [], []>} : vector<2x128xf32>, vector<128x128xf32>, vector<2x128xf32> -> vector<2x128xf32>
      %c0_50 = arith.constant 0 : index
      %c0_51 = arith.constant 0 : index
      %60 = vector.load %arg10[%c0_50, %c0_51] : memref<1x128xf32, #tpu.memory_space<vmem>>, vector<1x128xf32>
      %61 = vector.broadcast %60 : vector<1x128xf32> to vector<2x128xf32>
      %62 = arith.addf %59, %61 : vector<2x128xf32>
      %cst_52 = arith.constant dense<0xFF800000> : vector<2xf32>
      %63 = vector.multi_reduction <maximumf>, %62, %cst_52 [1] : vector<2x128xf32> to vector<2xf32>
      %64 = vector.shape_cast %63 : vector<2xf32> to vector<2x1xf32>
      %65 = vector.broadcast %64 : vector<2x1xf32> to vector<2x128xf32>
      %66 = arith.subf %62, %65 : vector<2x128xf32>
      %67 = math.exp %66 : vector<2x128xf32>
      %cst_53 = arith.constant dense<0.000000e+00> : vector<2xf32>
      %68 = vector.multi_reduction <add>, %67, %cst_53 [1] : vector<2x128xf32> to vector<2xf32>
      %69 = vector.shape_cast %68 : vector<2xf32> to vector<2x1xf32>
      %70 = vector.broadcast %69 : vector<2x1xf32> to vector<2x128xf32>
      %71 = arith.divf %67, %70 : vector<2x128xf32>
      %c0_54 = arith.constant 0 : index
      %c0_55 = arith.constant 0 : index
      %72 = vector.load %arg11[%c0_54, %c0_55] : memref<2x128xf32, #tpu.memory_space<vmem>>, vector<2x128xf32>
      tpu.vector_store %arg11[%c0_54, %c0_55], %71 {strides = array<i32>} : memref<2x128xf32, #tpu.memory_space<vmem>>, vector<2x128xf32>,
    } else {
    }
    return
  }
  func.func @transform_0(%arg0: i32, %arg1: i32) -> (i32, i32) {
    %c0_i32 = arith.constant 0 : i32
    return %arg0, %arg1 : i32, i32
  }
  func.func @transform_1(%arg0: i32, %arg1: i32) -> (i32, i32) {
    %c0_i32 = arith.constant 0 : i32
    return %arg0, %arg1 : i32, i32
  }
  func.func @transform_2(%arg0: i32, %arg1: i32) -> (i32, i32) {
    %c0_i32 = arith.constant 0 : i32
    %c0_i32_0 = arith.constant 0 : i32
    %c0_i32_1 = arith.constant 0 : i32
    return %c0_i32, %c0_i32_0 : i32, i32
  }
  func.func @transform_3(%arg0: i32, %arg1: i32) -> (i32, i32) {
    %c0_i32 = arith.constant 0 : i32
    %c0_i32_0 = arith.constant 0 : i32
    %c0_i32_1 = arith.constant 0 : i32
    return %c0_i32, %c0_i32_0 : i32, i32
  }
  func.func @transform_4(%arg0: i32, %arg1: i32) -> (i32, i32) {
    %c0_i32 = arith.constant 0 : i32
    %c0_i32_0 = arith.constant 0 : i32
    %c0_i32_1 = arith.constant 0 : i32
    return %c0_i32, %c0_i32_0 : i32, i32
  }
  func.func @transform_5(%arg0: i32, %arg1: i32) -> (i32, i32) {
    %c0_i32 = arith.constant 0 : i32
    %c0_i32_0 = arith.constant 0 : i32
    %c0_i32_1 = arith.constant 0 : i32
    return %c0_i32, %c0_i32_0 : i32, i32
  }
  func.func @transform_6(%arg0: i32, %arg1: i32) -> (i32, i32) {
    %c0_i32 = arith.constant 0 : i32
    %c0_i32_0 = arith.constant 0 : i32
    %c0_i32_1 = arith.constant 0 : i32
    return %c0_i32, %c0_i32_0 : i32, i32
  }
  func.func @transform_7(%arg0: i32, %arg1: i32) -> (i32, i32) {
    %c0_i32 = arith.constant 0 : i32
    %c0_i32_0 = arith.constant 0 : i32
    %c0_i32_1 = arith.constant 0 : i32
    return %c0_i32, %c0_i32_0 : i32, i32
  }
  func.func @transform_8(%arg0: i32, %arg1: i32) -> (i32, i32) {
    %c0_i32 = arith.constant 0 : i32
    %c0_i32_0 = arith.constant 0 : i32
    %c0_i32_1 = arith.constant 0 : i32
    return %c0_i32, %c0_i32_0 : i32, i32
  }
  func.func @transform_9(%arg0: i32, %arg1: i32) -> (i32, i32) {
    %c0_i32 = arith.constant 0 : i32
    %c0_i32_0 = arith.constant 0 : i32
    return %arg0, %c0_i32 : i32, i32
  }
}

</mosaic_0001>

<bundles_post_ra>
// kernel: tpu_custom_call.1
= control target key start
LH: loop header
LB: loop body
LE: loop exit
PB: predicated region body
PF: predicated region fallthrough
CT: control target
= control target key end

     0   :  { %14 = vsyncpa [#allocation5], 0  ;;  %s1037_s0 = inlined_call_operand.hbm [shape: f32[8,256], index: 0, kind: input, shape index: {}]   ;;  %s1038_s1 = inlined_call_operand.hbm [shape: f32[8,256], index: 1, kind: input, shape index: {}]   ;;  %s1039_s2 = inlined_call_operand.hbm [shape: f32[8,512], index: 2, kind: input, shape index: {}]   ;;  %s1040_s3 = inlined_call_operand.hbm [shape: f32[1,512], index: 3, kind: input, shape index: {}]   ;;  %s1041_s4 = inlined_call_operand.vmem [shape: f32[2,8], index: 4, kind: input, shape index: {}]   ;;  %s1042_s5 = inlined_call_operand.hbm [shape: f32[1024,128], index: 5, kind: input, shape index: {}]   ;;  %s1043_s6 = inlined_call_operand.vmem [shape: f32[1,128], index: 6, kind: input, shape index: {}]   ;;  %s1044_s7 = inlined_call_operand.hbm [shape: f32[128,128], index: 7, kind: input, shape index: {}]   ;;  %s1045_s8 = inlined_call_operand.vmem [shape: f32[1,128], index: 8, kind: input, shape index: {}]   ;;  %s1046_s9 = inlined_call_operand.hbm [shape: f32[2,128], index: 9, kind: output, shape index: {}]  }
   0x1   :  { %15 = vsyncpa [#allocation8], 0 }
   0x2   :  { %16 = vsyncpa [#allocation11], 0 }
   0x3   :  { %17 = vsyncpa [#allocation14], 0  ;;  %s35_s11 = sshll.u32 %s1038_s1, 4  ;;  %s36_s11 = int_to_ptr.hbm [resolvable:$true] %s35_s11 }
   0x4   :  { %18 = vsyncpa [#allocation6], 0  ;;  %s940_s12 = smov [#allocation7]   ;;  %s57_s16 = sshll.u32 %s1040_s3, 4  ;;  %s58_s16 = int_to_ptr.hbm [resolvable:$true] %s57_s16 }
   0x5   :  { %s37_s13 = sshll.u32 %s940_s12, 4  ;;  %s941_s17 = smov [#allocation10]   ;;  %s38_s13 = int_to_ptr.vmem [resolvable:$true] %s37_s13 }
   0x6   :  { %40 = dma.hbm_to_vmem [thread:$0]  %s36_s11, 256, %s38_s13, [#allocation8]  }
   0x7   :  { %s59_s18 = sshll.u32 %s941_s17, 4  ;;  %s24_s21 = sshll.u32 %s1037_s0, 4  ;;  %s60_s18 = int_to_ptr.vmem [resolvable:$true] %s59_s18  ;;  %s25_s21 = int_to_ptr.hbm [resolvable:$true] %s24_s21 }
   0x8   :  { %62 = dma.hbm_to_vmem [thread:$0]  %s58_s16, 64, %s60_s18, [#allocation11]  }
   0x9   :  { %s46_s23 = sshll.u32 %s1039_s2, 4  ;;  %s942_s24 = smov [#allocation4]   ;;  %s47_s23 = int_to_ptr.hbm [resolvable:$true] %s46_s23 }
   0xa   :  { %s26_s25 = sshll.u32 %s942_s24, 4  ;;  %s943_s3 = smov [#allocation9]   ;;  %s27_s25 = int_to_ptr.vmem [resolvable:$true] %s26_s25 }
   0xb   :  { %29 = dma.hbm_to_vmem [thread:$0]  %s25_s21, 256, %s27_s25, [#allocation5]  }
   0xc   :  { %s48_s26 = sshll.u32 %s943_s3, 4  ;;  %s69_s29 = sshll.u32 %s1042_s5, 4  ;;  %s49_s26 = int_to_ptr.vmem [resolvable:$true] %s48_s26  ;;  %s70_s29 = int_to_ptr.hbm [resolvable:$true] %s69_s29 }
   0xd   :  { %51 = dma.hbm_to_vmem [thread:$0]  %s47_s23, 512, %s49_s26, [#allocation8]  }
   0xe   :  { %s944_s0 = smov [#allocation12]   ;;  %s84_s2 = sshll.u32 %s1044_s7, 4  ;;  %s85_s2 = int_to_ptr.hbm [resolvable:$true] %s84_s2 }
   0xf   :  { %s71_s30 = sshll.u32 %s944_s0, 4  ;;  %s945_s12 = smov 128   ;;  %s72_s30 = int_to_ptr.vmem [resolvable:$true] %s71_s30 }
  0x10   :  { %s946_s13 = smov 8   ;;  %s947_s14 = smov [#allocation13]  }
  0x11   :  { %77 = dma.hbm_to_vmem [thread:$0]  %s70_s29, 16384, %s72_s30, [#allocation11], %s945_s12, %s945_s12, %s946_s13  }
  0x12   :  { %s86_s15 = sshll.u32 %s947_s14, 4  ;;  %s87_s15 = int_to_ptr.vmem [resolvable:$true] %s86_s15 }
  0x13   :  { %92 = dma.hbm_to_vmem [thread:$0]  %s85_s2, 2048, %s87_s15, [#allocation14], %s945_s12, %s945_s12, %s946_s13  }
  0x14   :  { %930 = dma.done.wait [#allocation5], 256  }
  0x15   :  { %931 = vsyncadd [#allocation5], 4294967040 }
  0x16   :  { %932 = dma.done.wait [#allocation8], 768  }
  0x17   :  { %933 = vsyncadd [#allocation8], 4294966528 }
  0x18   :  { %934 = dma.done.wait [#allocation11], 16448  }
  0x19   :  { %935 = vsyncadd [#allocation11], 4294950848 }
  0x1a   :  { %936 = dma.done.wait [#allocation14], 2048  }
  0x1b   :  { %937 = vsyncadd [#allocation14], 4294965248  ;;  %v127_v0 = vld [vmem:[#allocation4] sm:$0xff]  ;;  %v128_v1 = vld [vmem:[#allocation4 + $0x8] sm:$0xff]  ;;  %vm178_vm0 = vcmask 64512   ;;  %vm693_vm1 = vcmask 1041408  }
  0x1c   :  { %v156_v2 = vadd.f32 %v128_v1, %v127_v0  ;;  %v139_v3 = vld [vmem:[#allocation7] sm:$0xff]  ;;  %v140_v4 = vld [vmem:[#allocation7 + $0x8] sm:$0xff]  ;;  %v435_v9 = vld [vmem:[#allocation12 + $0x260] sm:$0xff]  ;;  %s726_s21 = sshll.u32 %s1046_s9, 4  ;;  %s727_s21 = int_to_ptr.hbm [resolvable:$true] %s726_s21 }
  0x1d   :  { %v268_v5 = vadd.f32 %v140_v4, %v139_v3  ;;  %v438_v6 = vld [vmem:[#allocation12 + $0x278] sm:$0xff]  ;;  %v437_v7 = vld [vmem:[#allocation12 + $0x270] sm:$0xff]  ;;  %v436_v8 = vld [vmem:[#allocation12 + $0x268] sm:$0xff] }
  0x1e   :  { %157 = vadd.xlane.f32.xlu0 %v156_v2  ;;  %487 = vmatpush.msra.mxu0 %v438_v6  ;;  %v434_v10 = vld [vmem:[#allocation12 + $0x258] sm:$0xff]  ;;  %v433_v12 = vld [vmem:[#allocation12 + $0x250] sm:$0xff]  ;;  %v160_v15 = vld [vmem:[#allocation9 + $0x8] sm:$0xff] }
  0x1f   :  { %v159_v11 = vld [vmem:[#allocation9] sm:$0xff]  ;;  %v161_v13 = vld [vmem:[#allocation9 + $0x10] sm:$0xff]  ;;  %v162_v14 = vld [vmem:[#allocation9 + $0x18] sm:$0xff] }
  0x20   :  { %488 = vmatpush.msra.mxu0 %v437_v7  ;;  %v432_v16 = vld [vmem:[#allocation12 + $0x248] sm:$0xff]  ;;  %v167_v22 = vld [vmem:[%s1041_s4] sm:$0x3]  ;;  %v431_v23 = vld [vmem:[#allocation12 + $0x240] sm:$0xff] }
  0x21   :  { %v430_v24 = vld [vmem:[#allocation12 + $0x238] sm:$0xff]  ;;  %v429_v25 = vld [vmem:[#allocation12 + $0x230] sm:$0xff]  ;;  %v428_v35 = vld [vmem:[#allocation12 + $0x228] sm:$0xff] }
  0x22   :  { %489 = vmatpush.msra.mxu0 %v436_v8  ;;  %v454_v31 = vld [vmem:[#allocation12 + $0x2f8] sm:$0xff]  ;;  %v453_v34 = vld [vmem:[#allocation12 + $0x2f0] sm:$0xff]  ;;  %v452_v38 = vld [vmem:[#allocation12 + $0x2e8] sm:$0xff] }
  0x23   :  { %v486_v32 = vld [vmem:[#allocation12 + $0x3f8] sm:$0xff]  ;;  %v485_v36 = vld [vmem:[#allocation12 + $0x3f0] sm:$0xff]  ;;  %v427_v39 = vld [vmem:[#allocation12 + $0x220] sm:$0xff] }
  0x24   :  { %490 = vmatpush.msra.mxu0 %v435_v9  ;;  %v470_v33 = vld [vmem:[#allocation12 + $0x378] sm:$0xff]  ;;  %v469_v37 = vld [vmem:[#allocation12 + $0x370] sm:$0xff]  ;;  %v484_v40 = vld [vmem:[#allocation12 + $0x3e8] sm:$0xff] }
  0x25   :  { %v468_v41 = vld [vmem:[#allocation12 + $0x368] sm:$0xff]  ;;  %v451_v42 = vld [vmem:[#allocation12 + $0x2e0] sm:$0xff]  ;;  %v426_v43 = vld [vmem:[#allocation12 + $0x218] sm:$0xff] }
  0x26   :  { %269 = vadd.xlane.f32.xlu0 %v268_v5  ;;  %491 = vmatpush.msra.mxu0 %v434_v10  ;;  %v483_v44 = vld [vmem:[#allocation12 + $0x3e0] sm:$0xff]  ;;  %v450_v45 = vld [vmem:[#allocation12 + $0x2d8] sm:$0xff]  ;;  %v425_v47 = vld [vmem:[#allocation12 + $0x210] sm:$0xff] }
  0x27   :  { %v467_v46 = vld [vmem:[#allocation12 + $0x360] sm:$0xff]  ;;  %v482_v48 = vld [vmem:[#allocation12 + $0x3d8] sm:$0xff]  ;;  %v449_v49 = vld [vmem:[#allocation12 + $0x2d0] sm:$0xff] }
  0x28   :  { %492 = vmatpush.msra.mxu0 %v433_v12  ;;  %v466_v50 = vld [vmem:[#allocation12 + $0x358] sm:$0xff]  ;;  %v424_v51 = vld [vmem:[#allocation12 + $0x208] sm:$0xff]  ;;  %v481_v52 = vld [vmem:[#allocation12 + $0x3d0] sm:$0xff] }
  0x29   :  { %v448_v53 = vld [vmem:[#allocation12 + $0x2c8] sm:$0xff]  ;;  %v465_v54 = vld [vmem:[#allocation12 + $0x350] sm:$0xff]  ;;  %v423_v55 = vld [vmem:[#allocation12 + $0x200] sm:$0xff] }
  0x2a   :  { %493 = vmatpush.msra.mxu0 %v432_v16  ;;  %v480_v56 = vld [vmem:[#allocation12 + $0x3c8] sm:$0xff]  ;;  %v447_v57 = vld [vmem:[#allocation12 + $0x2c0] sm:$0xff]  ;;  %v374_v59 = vld [vmem:[#allocation12 + $0x78] sm:$0xff] }
  0x2b   :  { %v464_v58 = vld [vmem:[#allocation12 + $0x348] sm:$0xff]  ;;  %v479_v60 = vld [vmem:[#allocation12 + $0x3c0] sm:$0xff]  ;;  %v446_v61 = vld [vmem:[#allocation12 + $0x2b8] sm:$0xff] }
  0x2c   :  { %494 = vmatpush.msra.mxu0 %v431_v23  ;;  %v463_v62 = vld [vmem:[#allocation12 + $0x340] sm:$0xff]  ;;  %v373_v63 = vld [vmem:[#allocation12 + $0x70] sm:$0xff]  ;;  %v478_v0 = vld [vmem:[#allocation12 + $0x3b8] sm:$0xff] }
  0x2d   :  { %v445_v1 = vld [vmem:[#allocation12 + $0x2b0] sm:$0xff]  ;;  %v462_v2 = vld [vmem:[#allocation12 + $0x338] sm:$0xff]  ;;  %v372_v3 = vld [vmem:[#allocation12 + $0x68] sm:$0xff] }
  0x2e   :  { %495 = vmatpush.msra.mxu0 %v430_v24  ;;  %v477_v4 = vld [vmem:[#allocation12 + $0x3b0] sm:$0xff]  ;;  %v444_v5 = vld [vmem:[#allocation12 + $0x2a8] sm:$0xff]  ;;  %v443_v8 = vld [vmem:[#allocation12 + $0x2a0] sm:$0xff] }
  0x2f   :  { %v461_v6 = vld [vmem:[#allocation12 + $0x330] sm:$0xff]  ;;  %v476_v7 = vld [vmem:[#allocation12 + $0x3a8] sm:$0xff]  ;;  %v475_v10 = vld [vmem:[#allocation12 + $0x3a0] sm:$0xff] }
  0x30   :  { %496 = vmatpush.msra.mxu0 %v429_v25  ;;  %v460_v9 = vld [vmem:[#allocation12 + $0x328] sm:$0xff]  ;;  %v459_v12 = vld [vmem:[#allocation12 + $0x320] sm:$0xff]  ;;  %v473_v16 = vld [vmem:[#allocation12 + $0x390] sm:$0xff] }
  0x31   :  { %v422_v23 = vld [vmem:[#allocation12 + $0x1f8] sm:$0xff]  ;;  %v421_v24 = vld [vmem:[#allocation12 + $0x1f0] sm:$0xff] }
  0x32   :  { %497 = vmatpush.msra.mxu0 %v428_v35  ;;  %v389_v25 = vld [vmem:[#allocation12 + $0xf0] sm:$0xff]  ;;  %v418_v35 = vld [vmem:[#allocation12 + $0x1d8] sm:$0xff] }
  0x34   :  { %498 = vmatpush.msra.mxu0 %v427_v39  ;;  %v417_v39 = vld [vmem:[#allocation12 + $0x1d0] sm:$0xff] }
  0x36   :  { %499 = vmatpush.msra.mxu0 %v426_v43  ;;  %v416_v43 = vld [vmem:[#allocation12 + $0x1c8] sm:$0xff] }
  0x38   :  { %500 = vmatpush.msra.mxu0 %v425_v47  ;;  %v415_v47 = vld [vmem:[#allocation12 + $0x1c0] sm:$0xff] }
  0x3a   :  { %501 = vmatpush.msra.mxu0 %v424_v51  ;;  %v414_v51 = vld [vmem:[#allocation12 + $0x1b8] sm:$0xff] }
  0x3c   :  { %502 = vmatpush.msra.mxu0 %v423_v55  ;;  %v413_v55 = vld [vmem:[#allocation12 + $0x1b0] sm:$0xff] }
  0x3e   :  { %567 = vmatpush.msrb.mxu0 %v374_v59  ;;  %v412_v59 = vld [vmem:[#allocation12 + $0x1a8] sm:$0xff] }
  0x40   :  { %568 = vmatpush.msrb.mxu0 %v373_v63  ;;  %v411_v63 = vld [vmem:[#allocation12 + $0x1a0] sm:$0xff] }
  0x42   :  { %569 = vmatpush.msrb.mxu0 %v372_v3  ;;  %v410_v3 = vld [vmem:[#allocation12 + $0x198] sm:$0xff] }
  0x91   :  { %v158_v17 = vpop.xlane.xlu0 %157 }
  0x92   :  { %v163_v18 = vmul.f32 %v159_v11, %v158_v17  ;;  %v165_v19 = vmul.f32 %v161_v13, %v158_v17  ;;  %v166_v20 = vmul.f32 %v162_v14, %v158_v17  ;;  %v164_v21 = vmul.f32 %v160_v15, %v158_v17  ;;  %v440_v17 = vld [vmem:[#allocation12 + $0x288] sm:$0xff] }
  0x94   :  { %197 = vmatpush.msra.mxu1 %v163_v18  ;;  %237 = vmatpush.msra.mxu2 %v165_v19  ;;  %v457_v18 = vld [vmem:[#allocation12 + $0x310] sm:$0xff]  ;;  %v472_v19 = vld [vmem:[#allocation12 + $0x388] sm:$0xff] }
  0x95   :  { %257 = vmatpush.msra.mxu3 %v166_v20  ;;  %741 = vmatmul.msk.f32.vlgmr.msra.gmra.mxu2 %vm178_vm0, %v167_v22  ;;  %v439_v20 = vld [vmem:[#allocation12 + $0x280] sm:$0xff] }
  0x96   :  { %217 = vmatpush.msrb.mxu1 %v164_v21  ;;  %742 = vmatmul.msk.f32.vlgmr.msra.gmra.mxu3 %vm178_vm0, %v167_v22  ;;  %v390_v21 = vld [vmem:[#allocation12 + $0xf8] sm:$0xff] }
  0x97   :  { %739 = vmatmul.msk.f32.vlgmr.msra.gmra.mxu1 %vm178_vm0, %v167_v22 }
  0x99   :  { %v270_v26 = vpop.xlane.xlu0 %269 }
  0x9a   :  { %v272_v27 = vmul.f32 %v270_v26, %v160_v15  ;;  %v273_v28 = vmul.f32 %v270_v26, %v161_v13  ;;  %v271_v29 = vmul.f32 %v270_v26, %v159_v11  ;;  %v274_v30 = vmul.f32 %v270_v26, %v162_v14  ;;  %v442_v11 = vld [vmem:[#allocation12 + $0x298] sm:$0xff]  ;;  %v441_v14 = vld [vmem:[#allocation12 + $0x290] sm:$0xff]  ;;  %v420_v26 = vld [vmem:[#allocation12 + $0x1e8] sm:$0xff] }
  0x9b   :  { %v474_v13 = vld [vmem:[#allocation12 + $0x398] sm:$0xff] }
  0x9c   :  { %290 = vmatpush.msrb.mxu2 %v271_v29  ;;  %310 = vmatpush.msra.mxu1 %v272_v27  ;;  %v458_v15 = vld [vmem:[#allocation12 + $0x318] sm:$0xff]  ;;  %v456_v27 = vld [vmem:[#allocation12 + $0x308] sm:$0xff] }
  0x9d   :  { %350 = vmatpush.msrb.mxu3 %v274_v30  ;;  %743 = vmatmul.msk.f32.vlgmr.msrb.gmra.mxu2 %vm178_vm0, %v167_v22  ;;  %v388_v29 = vld [vmem:[#allocation12 + $0xe8] sm:$0xff]  ;;  %v419_v30 = vld [vmem:[#allocation12 + $0x1e0] sm:$0xff] }
  0x9e   :  { %330 = vmatpush.msra.mxu2 %v273_v28  ;;  %746 = vmatmul.msk.f32.vlgmr.msrb.gmra.mxu3 %vm178_vm0, %v167_v22  ;;  %v371_v28 = vld [vmem:[#allocation12 + $0x60] sm:$0xff] }
  0x9f   :  { %740 = vmatmul.msk.f32.vlgmr.msrb.gmra.mxu1 %vm178_vm0, %v167_v22  ;;  %547 = vmatpush.msra.mxu3 %v486_v32  ;;  %v370_v32 = vld [vmem:[#allocation12 + $0x58] sm:$0xff] }
  0xa0   :  { %507 = vmatpush.msrb.mxu1 %v454_v31  ;;  %527 = vmatpush.msrb.mxu2 %v470_v33  ;;  %v455_v31 = vld [vmem:[#allocation12 + $0x300] sm:$0xff]  ;;  %v406_v33 = vld [vmem:[#allocation12 + $0x178] sm:$0xff] }
  0xa1   :  { %548 = vmatpush.msra.mxu3 %v485_v36  ;;  %570 = vmatpush.msrb.mxu0 %v371_v28  ;;  %v369_v36 = vld [vmem:[#allocation12 + $0x50] sm:$0xff] }
  0xa2   :  { %508 = vmatpush.msrb.mxu1 %v453_v34  ;;  %528 = vmatpush.msrb.mxu2 %v469_v37  ;;  %v387_v34 = vld [vmem:[#allocation12 + $0xe0] sm:$0xff]  ;;  %v405_v37 = vld [vmem:[#allocation12 + $0x170] sm:$0xff] }
  0xa3   :  { %549 = vmatpush.msra.mxu3 %v484_v40  ;;  %571 = vmatpush.msrb.mxu0 %v370_v32  ;;  %v368_v40 = vld [vmem:[#allocation12 + $0x48] sm:$0xff] }
  0xa4   :  { %509 = vmatpush.msrb.mxu1 %v452_v38  ;;  %529 = vmatpush.msrb.mxu2 %v468_v41  ;;  %v386_v38 = vld [vmem:[#allocation12 + $0xd8] sm:$0xff]  ;;  %v404_v41 = vld [vmem:[#allocation12 + $0x168] sm:$0xff] }
  0xa5   :  { %745 = vmatmul.msk.f32.vlgmr.msra.gmra.mxu2 %vm178_vm0, %v167_v22  ;;  %550 = vmatpush.msra.mxu3 %v483_v44  ;;  %v367_v44 = vld [vmem:[#allocation12 + $0x40] sm:$0xff] }
  0xa6   :  { %510 = vmatpush.msrb.mxu1 %v451_v42  ;;  %530 = vmatpush.msrb.mxu2 %v467_v46  ;;  %v385_v42 = vld [vmem:[#allocation12 + $0xd0] sm:$0xff]  ;;  %v384_v46 = vld [vmem:[#allocation12 + $0xc8] sm:$0xff] }
  0xa7   :  { %744 = vmatmul.msk.f32.vlgmr.msra.gmra.mxu1 %vm178_vm0, %v167_v22  ;;  %551 = vmatpush.msra.mxu3 %v482_v48  ;;  %v471_v22 = vld [vmem:[#allocation12 + $0x380] sm:$0xff]  ;;  %v366_v48 = vld [vmem:[#allocation12 + $0x38] sm:$0xff] }
  0xa8   :  { %511 = vmatpush.msrb.mxu1 %v450_v45  ;;  %531 = vmatpush.msrb.mxu2 %v466_v50  ;;  %v403_v45 = vld [vmem:[#allocation12 + $0x160] sm:$0xff] }
  0xa9   :  { %552 = vmatpush.msra.mxu3 %v481_v52  ;;  %572 = vmatpush.msrb.mxu0 %v369_v36  ;;  %v383_v50 = vld [vmem:[#allocation12 + $0xc0] sm:$0xff]  ;;  %v365_v52 = vld [vmem:[#allocation12 + $0x30] sm:$0xff] }
  0xaa   :  { %512 = vmatpush.msrb.mxu1 %v449_v49  ;;  %532 = vmatpush.msrb.mxu2 %v465_v54  ;;  %v402_v49 = vld [vmem:[#allocation12 + $0x158] sm:$0xff] }
  0xab   :  { %553 = vmatpush.msra.mxu3 %v480_v56  ;;  %573 = vmatpush.msrb.mxu0 %v368_v40  ;;  %v382_v54 = vld [vmem:[#allocation12 + $0xb8] sm:$0xff]  ;;  %v364_v56 = vld [vmem:[#allocation12 + $0x28] sm:$0xff] }
  0xac   :  { %513 = vmatpush.msrb.mxu1 %v448_v53  ;;  %533 = vmatpush.msrb.mxu2 %v464_v58  ;;  %v401_v53 = vld [vmem:[#allocation12 + $0x150] sm:$0xff] }
  0xad   :  { %554 = vmatpush.msra.mxu3 %v479_v60  ;;  %574 = vmatpush.msrb.mxu0 %v367_v44  ;;  %v381_v58 = vld [vmem:[#allocation12 + $0xb0] sm:$0xff]  ;;  %v363_v60 = vld [vmem:[#allocation12 + $0x20] sm:$0xff] }
  0xae   :  { %514 = vmatpush.msrb.mxu1 %v447_v57  ;;  %534 = vmatpush.msrb.mxu2 %v463_v62  ;;  %v400_v57 = vld [vmem:[#allocation12 + $0x148] sm:$0xff] }
  0xaf   :  { %555 = vmatpush.msra.mxu3 %v478_v0  ;;  %575 = vmatpush.msrb.mxu0 %v366_v48  ;;  %v380_v62 = vld [vmem:[#allocation12 + $0xa8] sm:$0xff]  ;;  %v362_v0 = vld [vmem:[#allocation12 + $0x18] sm:$0xff] }
  0xb0   :  { %515 = vmatpush.msrb.mxu1 %v446_v61  ;;  %535 = vmatpush.msrb.mxu2 %v462_v2  ;;  %v399_v61 = vld [vmem:[#allocation12 + $0x140] sm:$0xff] }
  0xb1   :  { %556 = vmatpush.msra.mxu3 %v477_v4  ;;  %576 = vmatpush.msrb.mxu0 %v365_v52  ;;  %v379_v2 = vld [vmem:[#allocation12 + $0xa0] sm:$0xff]  ;;  %v361_v4 = vld [vmem:[#allocation12 + $0x10] sm:$0xff]  ;;  %v666_v52 = vld [vmem:[#allocation13 + $0x68] sm:$0xff] }
  0xb2   :  { %516 = vmatpush.msrb.mxu1 %v445_v1  ;;  %536 = vmatpush.msrb.mxu2 %v461_v6  ;;  %v398_v1 = vld [vmem:[#allocation12 + $0x138] sm:$0xff] }
  0xb3   :  { %557 = vmatpush.msra.mxu3 %v476_v7  ;;  %577 = vmatpush.msrb.mxu0 %v364_v56  ;;  %v378_v6 = vld [vmem:[#allocation12 + $0x98] sm:$0xff]  ;;  %v409_v7 = vld [vmem:[#allocation12 + $0x190] sm:$0xff]  ;;  %v662_v56 = vld [vmem:[#allocation13 + $0x48] sm:$0xff] }
  0xb4   :  { %517 = vmatpush.msrb.mxu1 %v444_v5  ;;  %537 = vmatpush.msrb.mxu2 %v460_v9  ;;  %v397_v5 = vld [vmem:[#allocation12 + $0x130] sm:$0xff]  ;;  %v396_v9 = vld [vmem:[#allocation12 + $0x128] sm:$0xff] }
  0xb5   :  { %558 = vmatpush.msra.mxu3 %v475_v10  ;;  %578 = vmatpush.msrb.mxu0 %v363_v60  ;;  %v377_v10 = vld [vmem:[#allocation12 + $0x90] sm:$0xff]  ;;  %v658_v60 = vld [vmem:[#allocation13 + $0x28] sm:$0xff] }
  0xb6   :  { %518 = vmatpush.msrb.mxu1 %v443_v8  ;;  %538 = vmatpush.msrb.mxu2 %v459_v12  ;;  %v360_v8 = vld [vmem:[#allocation12 + $0x8] sm:$0xff]  ;;  %v359_v12 = vld [vmem:[#allocation12] sm:$0xff] }
  0xb7   :  { %559 = vmatpush.msra.mxu3 %v474_v13  ;;  %579 = vmatpush.msrb.mxu0 %v362_v0  ;;  %v395_v13 = vld [vmem:[#allocation12 + $0x120] sm:$0xff]  ;;  %v654_v0 = vld [vmem:[#allocation13 + $0x8] sm:$0xff] }
  0xb8   :  { %519 = vmatpush.msrb.mxu1 %v442_v11  ;;  %539 = vmatpush.msrb.mxu2 %v458_v15  ;;  %v408_v11 = vld [vmem:[#allocation12 + $0x188] sm:$0xff]  ;;  %v407_v15 = vld [vmem:[#allocation12 + $0x180] sm:$0xff] }
  0xb9   :  { %560 = vmatpush.msra.mxu3 %v473_v16  ;;  %580 = vmatpush.msrb.mxu0 %v361_v4  ;;  %v394_v16 = vld [vmem:[#allocation12 + $0x118] sm:$0xff] }
  0xba   :  { %520 = vmatpush.msrb.mxu1 %v441_v14  ;;  %540 = vmatpush.msrb.mxu2 %v457_v18  ;;  %v376_v14 = vld [vmem:[#allocation12 + $0x88] sm:$0xff]  ;;  %v393_v18 = vld [vmem:[#allocation12 + $0x110] sm:$0xff] }
  0xbb   :  { %561 = vmatpush.msra.mxu3 %v472_v19  ;;  %581 = vmatpush.msrb.mxu0 %v360_v8  ;;  %v392_v19 = vld [vmem:[#allocation12 + $0x108] sm:$0xff] }
  0xbc   :  { %521 = vmatpush.msrb.mxu1 %v440_v17  ;;  %541 = vmatpush.msrb.mxu2 %v456_v27  ;;  %v375_v17 = vld [vmem:[#allocation12 + $0x80] sm:$0xff] }
  0xbd   :  { %562 = vmatpush.msra.mxu3 %v471_v22  ;;  %582 = vmatpush.msrb.mxu0 %v359_v12 }
  0xbe   :  { %522 = vmatpush.msrb.mxu1 %v439_v20  ;;  %542 = vmatpush.msrb.mxu2 %v455_v31 }
  0xbf   :  { %627 = vmatpush.msrb.mxu3 %v422_v23 }
  0xc0   :  { %587 = vmatpush.msra.mxu1 %v390_v21  ;;  %607 = vmatpush.msra.mxu2 %v406_v33  ;;  %v391_v21 = vld [vmem:[#allocation12 + $0x100] sm:$0xff] }
  0xc1   :  { %628 = vmatpush.msrb.mxu3 %v421_v24 }
  0xc2   :  { %588 = vmatpush.msra.mxu1 %v389_v25  ;;  %608 = vmatpush.msra.mxu2 %v405_v37  ;;  %v168_v25 = vld [vmem:[#allocation10] sm:$0xf] }
  0xc3   :  { %629 = vmatpush.msrb.mxu3 %v420_v26  ;;  %v173_v26 = vperm.slane %v168_v25, 3  ;;  %v170_v27 = vperm.slane %v168_v25, 0  ;;  %v171_v28 = vperm.slane %v168_v25, 1 }
  0xc4   :  { %589 = vmatpush.msra.mxu1 %v388_v29  ;;  %609 = vmatpush.msra.mxu2 %v404_v41 }
  0xc5   :  { %630 = vmatpush.msrb.mxu3 %v419_v30 }
  0xc6   :  { %590 = vmatpush.msra.mxu1 %v387_v34  ;;  %610 = vmatpush.msra.mxu2 %v403_v45 }
  0xc7   :  { %631 = vmatpush.msrb.mxu3 %v418_v35 }
  0xc8   :  { %591 = vmatpush.msra.mxu1 %v386_v38  ;;  %611 = vmatpush.msra.mxu2 %v402_v49 }
  0xc9   :  { %632 = vmatpush.msrb.mxu3 %v417_v39  ;;  %v172_v39 = vperm.slane %v168_v25, 2 }
  0xca   :  { %592 = vmatpush.msra.mxu1 %v385_v42  ;;  %612 = vmatpush.msra.mxu2 %v401_v53  ;;  %v665_v53 = vld [vmem:[#allocation13 + $0x60] sm:$0xff] }
  0xcb   :  { %633 = vmatpush.msrb.mxu3 %v416_v43 }
  0xcc   :  { %593 = vmatpush.msra.mxu1 %v384_v46  ;;  %613 = vmatpush.msra.mxu2 %v400_v57  ;;  %v661_v57 = vld [vmem:[#allocation13 + $0x40] sm:$0xff] }
  0xcd   :  { %634 = vmatpush.msrb.mxu3 %v415_v47 }
  0xce   :  { %594 = vmatpush.msra.mxu1 %v383_v50  ;;  %614 = vmatpush.msra.mxu2 %v399_v61  ;;  %v668_v50 = vld [vmem:[#allocation13 + $0x78] sm:$0xff]  ;;  %v657_v61 = vld [vmem:[#allocation13 + $0x20] sm:$0xff] }
  0xcf   :  { %635 = vmatpush.msrb.mxu3 %v414_v51  ;;  %v667_v51 = vld [vmem:[#allocation13 + $0x70] sm:$0xff] }
  0xd0   :  { %595 = vmatpush.msra.mxu1 %v382_v54  ;;  %615 = vmatpush.msra.mxu2 %v398_v1  ;;  %v664_v54 = vld [vmem:[#allocation13 + $0x58] sm:$0xff]  ;;  %v653_v1 = vld [vmem:[#allocation13] sm:$0xff] }
  0xd1   :  { %636 = vmatpush.msrb.mxu3 %v413_v55  ;;  %v663_v55 = vld [vmem:[#allocation13 + $0x50] sm:$0xff] }
  0xd2   :  { %596 = vmatpush.msra.mxu1 %v381_v58  ;;  %616 = vmatpush.msra.mxu2 %v397_v5  ;;  %v660_v58 = vld [vmem:[#allocation13 + $0x38] sm:$0xff] }
  0xd3   :  { %637 = vmatpush.msrb.mxu3 %v412_v59  ;;  %v659_v59 = vld [vmem:[#allocation13 + $0x30] sm:$0xff] }
  0xd4   :  { %597 = vmatpush.msra.mxu1 %v380_v62  ;;  %617 = vmatpush.msra.mxu2 %v396_v9  ;;  %v656_v62 = vld [vmem:[#allocation13 + $0x18] sm:$0xff] }
  0xd5   :  { %638 = vmatpush.msrb.mxu3 %v411_v63  ;;  %v655_v63 = vld [vmem:[#allocation13 + $0x10] sm:$0xff] }
  0xd6   :  { %598 = vmatpush.msra.mxu1 %v379_v2  ;;  %618 = vmatpush.msra.mxu2 %v395_v13 }
  0xd7   :  { %639 = vmatpush.msrb.mxu3 %v410_v3 }
  0xd8   :  { %599 = vmatpush.msra.mxu1 %v378_v6  ;;  %619 = vmatpush.msra.mxu2 %v394_v16 }
  0xd9   :  { %640 = vmatpush.msrb.mxu3 %v409_v7 }
  0xda   :  { %600 = vmatpush.msra.mxu1 %v377_v10  ;;  %620 = vmatpush.msra.mxu2 %v393_v18 }
  0xdb   :  { %641 = vmatpush.msrb.mxu3 %v408_v11 }
  0xdc   :  { %601 = vmatpush.msra.mxu1 %v376_v14  ;;  %621 = vmatpush.msra.mxu2 %v392_v19 }
  0xdd   :  { %642 = vmatpush.msrb.mxu3 %v407_v15  ;;  %v756_v15 = vld [vmem:[%s1043_s6] ss:$0 sm:$0xff]  ;;  %s948_s6 = smov [#allocation15]  }
  0xde   :  { %602 = vmatpush.msra.mxu1 %v375_v17  ;;  %622 = vmatpush.msra.mxu2 %v391_v21 }
 0x114   :  { %v199_v20 = vpop.f32.mrf.mxu1 }
 0x115   :  { %v200_v38 = vadd.f32 %v199_v20, %v170_v27  ;;  %v757_v20 = vld [vmem:[%s1045_s8] ss:$0 sm:$0xff]  ;;  %s724_s8 = sshll.u32 %s948_s6, 4  ;;  %s725_s8 = int_to_ptr.vmem [resolvable:$true] %s724_s8 }
 0x117   :  { %v262_v44 = vmax.f32 %v200_v38, 0.0 }
 0x118   :  { %v239_v22 = vpop.f32.mrf.mxu2 }
 0x119   :  { %v259_v23 = vpop.f32.mrf.mxu3  ;;  %v240_v48 = vadd.f32 %v239_v22, %v172_v39 }
 0x11a   :  { %v260_v40 = vadd.f32 %v259_v23, %v173_v26 }
 0x11b   :  { %v264_v49 = vmax.f32 %v240_v48, 0.0 }
 0x11c   :  { %v219_v24 = vpop.f32.mrf.mxu1  ;;  %v265_v46 = vmax.f32 %v260_v40, 0.0 }
 0x11d   :  { %v220_v42 = vadd.f32 %v219_v24, %v171_v28 }
 0x11f   :  { %v263_v47 = vmax.f32 %v220_v42, 0.0 }
 0x120   :  { %v292_v29 = vpop.f32.mrf.mxu2 }
 0x121   :  { %v293_v30 = vadd.f32 %v292_v29, %v170_v27  ;;  %v352_v31 = vpop.f32.mrf.mxu3 }
 0x122   :  { %v353_v32 = vadd.f32 %v352_v31, %v173_v26 }
 0x123   :  { %v355_v34 = vmax.f32 %v293_v30, 0.0 }
 0x124   :  { %v312_v33 = vpop.f32.mrf.mxu1  ;;  %v358_v36 = vmax.f32 %v353_v32, 0.0 }
 0x125   :  { %v313_v35 = vadd.f32 %v312_v33, %v171_v28  ;;  %503 = vmatmul.f32.vlgmr.msra.gmra.mxu0 %v355_v34 }
 0x126   :  { %563 = vmatmul.f32.vlgmr.msra.gmra.mxu3 %v358_v36  ;;  %673 = vmatpush.msra.mxu0 %v668_v50 }
 0x127   :  { %v356_v37 = vmax.f32 %v313_v35, 0.0 }
 0x128   :  { %v332_v41 = vpop.f32.mrf.mxu2  ;;  %674 = vmatpush.msra.mxu0 %v667_v51 }
 0x129   :  { %523 = vmatmul.f32.vlgmr.msrb.gmra.mxu1 %v356_v37  ;;  %v333_v43 = vadd.f32 %v332_v41, %v172_v39 }
 0x12a   :  { %675 = vmatpush.msra.mxu0 %v666_v52 }
 0x12b   :  { %v357_v45 = vmax.f32 %v333_v43, 0.0 }
 0x12c   :  { %676 = vmatpush.msra.mxu0 %v665_v53 }
 0x12d   :  { %543 = vmatmul.f32.vlgmr.msrb.gmra.mxu2 %v357_v45  ;;  %583 = vmatmul.f32.vlgmr.msrb.gmra.mxu0 %v262_v44 }
 0x12e   :  { %643 = vmatmul.f32.vlgmr.msrb.gmra.mxu3 %v265_v46  ;;  %677 = vmatpush.msra.mxu0 %v664_v54 }
 0x130   :  { %678 = vmatpush.msra.mxu0 %v663_v55 }
 0x131   :  { %603 = vmatmul.f32.vlgmr.msra.gmra.mxu1 %v263_v47 }
 0x132   :  { %679 = vmatpush.msra.mxu0 %v662_v56 }
 0x134   :  { %680 = vmatpush.msra.mxu0 %v661_v57 }
 0x135   :  { %623 = vmatmul.f32.vlgmr.msra.gmra.mxu2 %v264_v49 }
 0x136   :  { %681 = vmatpush.msra.mxu0 %v660_v58 }
 0x138   :  { %682 = vmatpush.msra.mxu0 %v659_v59 }
 0x13a   :  { %683 = vmatpush.msra.mxu0 %v658_v60 }
 0x13c   :  { %684 = vmatpush.msra.mxu0 %v657_v61 }
 0x13e   :  { %685 = vmatpush.msra.mxu0 %v656_v62 }
 0x140   :  { %686 = vmatpush.msra.mxu0 %v655_v63 }
 0x142   :  { %687 = vmatpush.msra.mxu0 %v654_v0 }
 0x144   :  { %688 = vmatpush.msra.mxu0 %v653_v1 }
 0x1a2   :  { %v504_v2 = vpop.f32.mrf.mxu0 }
 0x1a6   :  { %v524_v3 = vpop.f32.mrf.mxu1 }
 0x1a7   :  { %v525_v4 = vadd.f32 %v524_v3, %v504_v2 }
 0x1a9   :  { %v564_v5 = vpop.f32.mrf.mxu3 }
 0x1aa   :  { %v584_v9 = vpop.f32.mrf.mxu0 }
 0x1ae   :  { %v604_v11 = vpop.f32.mrf.mxu1 }
 0x1b0   :  { %v544_v6 = vpop.f32.mrf.mxu2 }
 0x1b1   :  { %v545_v7 = vadd.f32 %v544_v6, %v525_v4  ;;  %v644_v16 = vpop.f32.mrf.mxu3 }
 0x1b3   :  { %v565_v8 = vadd.f32 %v564_v5, %v545_v7 }
 0x1b5   :  { %v585_v10 = vadd.f32 %v584_v9, %v565_v8 }
 0x1b7   :  { %v605_v12 = vadd.f32 %v604_v11, %v585_v10 }
 0x1b8   :  { %v624_v13 = vpop.f32.mrf.mxu2 }
 0x1b9   :  { %v625_v14 = vadd.f32 %v624_v13, %v605_v12 }
 0x1bb   :  { %v645_v17 = vadd.f32 %v644_v16, %v625_v14 }
 0x1bd   :  { %v651_v18 = vadd.f32 %v756_v15, %v645_v17 }
 0x1bf   :  { %v652_v19 = vmax.f32 %v651_v18, 0.0 }
 0x1c1   :  { %689 = vmatmul.f32.vlgmr.msra.gmra.mxu0 %v652_v19 }
 0x23e   :  { %v690_v21 = vpop.f32.mrf.mxu0 }
 0x23f   :  { %v691_v22 = vadd.f32 %v757_v20, %v690_v21 }
 0x241   :  { %v694_v23 = vsel %vm693_vm1, %v691_v22, -inf }
 0x242   :  { %695 = vmax.xlane.f32.xlu1 %v694_v23 }
 0x2b5   :  { %v696_v24 = vpop.xlane.xlu1 %695 }
 0x2b6   :  { %v697_v25 = vsub.f32 %v691_v22, %v696_v24 }
 0x2b8   :  { %v698_v26 = vmul.f32 1.442695, %v697_v25 }
 0x2ba   :  { %758 = vpow2.f32 %v698_v26 }
 0x2c0   :  { %v759_v27 = vpop.eup %758 }
 0x2c1   :  { %v700_v28 = vsel %vm693_vm1, %v759_v27, 0.0 }
 0x2c2   :  { %701 = vadd.xlane.f32.xlu1 %v700_v28 }
 0x335   :  { %v702_v29 = vpop.xlane.xlu1 %701 }
 0x336   :  { %760 = vrcp.f32 %v702_v29  ;;  %v714_v33 = vand.u32 2147483648, %v702_v29  ;;  %v712_v35 = vand.u32 2147483647, %v702_v29  ;;  %vm708_vm3 = vweird.f32 %v702_v29 }
 0x338   :  { %v715_v37 = vor.u32 1.1754944e-38, %v714_v33  ;;  %vm713_vm5 = vcmp.eq.f32.partialorder %v712_v35, 8.507059e+37 }
 0x33c   :  { %v761_v30 = vpop.eup %760 }
 0x33d   :  { %v704_v31 = vmul.f32 %v761_v30, %v702_v29  ;;  %vm709_vm2 = vweird.f32 %v761_v30 }
 0x33e   :  { %vm710_vm4 = vmor %vm708_vm3, %vm709_vm2 }
 0x33f   :  { %v705_v32 = vsub.f32 1.0, %v704_v31 }
 0x341   :  { %v706_v34 = vmul.f32 %v761_v30, %v705_v32 }
 0x343   :  { %v707_v36 = vadd.f32 %v761_v30, %v706_v34 }
 0x345   :  { %v711_v38 = vsel %vm710_vm4, %v761_v30, %v707_v36 }
 0x346   :  { %v716_v39 = vsel %vm713_vm5, %v715_v37, %v711_v38 }
 0x347   :  { %v717_v40 = vmul.f32 %v759_v27, %v716_v39 }
 0x349   :  { %718 = vst [vmem:[#allocation15] sm:$0x3] %v717_v40 }
 0x34a   :  { %729 = dma.vmem_to_hbm [thread:$0]  %s725_s8, 32, %s727_s21, [#allocation6]  }
 0x34b   :  { %938 = dma.done.wait [#allocation6], 32  }
 0x34c   :  { %939 = vsyncadd [#allocation6], 4294967264 }
 0x34d   :  { %734 = vsyncpa [#allocation5], 1 }
 0x34e   :  { %735 = vsyncpa [#allocation8], 1 }
 0x34f   :  { %736 = vsyncpa [#allocation11], 1 }
 0x350   :  { %737 = vsyncpa [#allocation14], 1 }
 0x351   :  { %738 = vsyncpa [#allocation6], 1 }

</bundles_post_ra>
